<compile_context>
chip_gen: v7x
topology: tpu7x:2x2x1
jax: 0.10.0
libtpu: 0.0.40
codegen_flags: <defaults>
</compile_context>

<pallas_src>
import jax
import jax.numpy as jnp
from jax.experimental import pallas as pl
from jax.experimental.pallas import tpu as pltpu

H1, H2 = 400, 300          # logical hidden dims (PyTorch module)
H1P, H2P = 512, 384        # lane-padded hidden dims (multiples of 128)


def _r_hat_kernel(s_ref, a_ref, w1s_ref, w1a_ref, b1_ref, w2_ref, b2_ref,
                  w3_ref, b3_ref, out_ref):
    # Layer 1: fused concat -> two small-K bf16 matmuls, f32 accumulation.
    h1 = jnp.dot(s_ref[...], w1s_ref[...], preferred_element_type=jnp.float32)
    h1 = h1 + jnp.dot(a_ref[...], w1a_ref[...],
                      preferred_element_type=jnp.float32)
    h1 = jnp.maximum(h1 + b1_ref[...], 0.0)                      # (tb, H1P) f32

    # Layer 2: bf16 matmul, f32 accumulation, bias+ReLU in f32.
    h2 = jnp.dot(h1.astype(jnp.bfloat16), w2_ref[...],
                 preferred_element_type=jnp.float32)
    h2 = jnp.maximum(h2 + b2_ref[...], 0.0)                      # (tb, H2P) f32

    # Layer 3 (N=1): VPU multiply + XLU lane reduce instead of a 1-column MXU
    # matmul; emit a lane-dense (1, 1, tb) block (b3 is an SMEM scalar).
    y = jnp.sum(h2 * w3_ref[...], axis=-1) + b3_ref[0]           # (tb,) f32
    out_ref[...] = y[None, None, :].astype(out_ref.dtype)


def _pad2(x, rows, cols):
    return jnp.pad(x, ((0, rows - x.shape[0]), (0, cols - x.shape[1])))


def _pick_batch_tile(batch, max_tile=1024):
    """Batch tile: divides `batch`, multiple of 8, <= max_tile, gives >= 2 grid
    steps (megacore); prefers lane-dense multiples of 128. Falls back to B."""
    candidates = [tb for tb in range(8, min(batch, max_tile) + 1, 8)
                  if batch % tb == 0 and batch // tb >= 2]
    if not candidates:
        return batch
    lane_dense = [tb for tb in candidates if tb % 128 == 0]
    return max(lane_dense) if lane_dense else max(candidates)


def compute_r_hat(state, action, params, *, batch_tile=None):
    """state: (B, state_dim), action: (B, action_dim) -> (B, 1) float32."""
    w1, b1, w2, b2, w3, b3 = params
    B, S = state.shape
    A = action.shape[1]

    # ---- parameter prep (cheap, fuses into the surrounding jit) ------------
    w1_s = _pad2(w1[:S], S, H1P).astype(jnp.bfloat16)            # (S, H1P)
    w1_a = _pad2(w1[S:], A, H1P).astype(jnp.bfloat16)            # (A, H1P)
    b1p = _pad2(b1.reshape(1, H1), 1, H1P).astype(jnp.float32)   # (1, H1P)
    w2p = _pad2(w2, H1P, H2P).astype(jnp.bfloat16)               # (H1P, H2P)
    b2p = _pad2(b2.reshape(1, H2), 1, H2P).astype(jnp.float32)   # (1, H2P)
    w3r = _pad2(w3.reshape(H2, 1).T, 1, H2P).astype(jnp.float32) # (1, H2P)
    b3s = b3.reshape(1).astype(jnp.float32)                      # SMEM scalar

    tb = _pick_batch_tile(B) if batch_tile is None else batch_tile
    assert B % tb == 0 and (tb % 8 == 0 or tb == B)
    nt = B // tb

    state_b = state.astype(jnp.bfloat16)
    action_b = action.astype(jnp.bfloat16)

    # Constant-index weight/bias blocks: single-buffered (stay resident).
    def w_spec(shape):
        return pl.BlockSpec(shape, lambda i: (0, 0),
                            pipeline_mode=pl.Buffered(1))

    slab = pl.pallas_call(
        _r_hat_kernel,
        out_shape=jax.ShapeDtypeStruct((nt, 1, tb), jnp.float32),
        grid_spec=pltpu.PrefetchScalarGridSpec(
            num_scalar_prefetch=0,
            grid=(nt,),
            in_specs=[
                pl.BlockSpec((tb, S), lambda i: (i, 0)),   # state tile
                pl.BlockSpec((tb, A), lambda i: (i, 0)),   # action tile
                w_spec((S, H1P)),                          # w1 (state rows)
                w_spec((A, H1P)),                          # w1 (action rows)
                w_spec((1, H1P)),                          # b1
                w_spec((H1P, H2P)),                        # w2
                w_spec((1, H2P)),                          # b2
                w_spec((1, H2P)),                          # w3 as a row
                pl.BlockSpec(memory_space=pltpu.MemorySpace.SMEM),  # b3
            ],
            out_specs=pl.BlockSpec((1, 1, tb), lambda i: (i, 0, 0)),
        ),
        compiler_params=pltpu.CompilerParams(
            dimension_semantics=("parallel",),
        ),
    )(state_b, action_b, w1_s, w1_a, b1p, w2p, b2p, w3r, b3s)

    return slab.reshape(B, 1)


def init_params(key, state_dim, action_dim):
    """nn.Linear-style init; weights stored as (in_features, out_features)."""
    d_in = state_dim + action_dim
    ks = jax.random.split(key, 6)

    def lin(kw, kb, fan_in, fan_out):
        bound = 1.0 / jnp.sqrt(jnp.float32(fan_in))
        w = jax.random.uniform(kw, (fan_in, fan_out), jnp.float32, -bound, bound)
        b = jax.random.uniform(kb, (1, fan_out), jnp.float32, -bound, bound)
        return w, b

    w1, b1 = lin(ks[0], ks[1], d_in, H1)
    w2, b2 = lin(ks[2], ks[3], H1, H2)
    w3, b3 = lin(ks[4], ks[5], H2, 1)
    return (w1, b1, w2, b2, w3, b3)


def _reference_bf16(state, action, params):
    """Same numerics as the kernel: bf16 matmul operands, f32 accumulation."""
    w1, b1, w2, b2, w3, b3 = params
    x = jnp.concatenate([state, action], axis=1).astype(jnp.bfloat16)
    h1 = jnp.maximum(jnp.dot(x, w1.astype(jnp.bfloat16),
                             preferred_element_type=jnp.float32) + b1, 0.0)
    h2 = jnp.maximum(jnp.dot(h1.astype(jnp.bfloat16), w2.astype(jnp.bfloat16),
                             preferred_element_type=jnp.float32) + b2, 0.0)
    return jnp.dot(h2, w3) + b3


def _reference_f32(state, action, params):
    w1, b1, w2, b2, w3, b3 = params
    x = jnp.concatenate([state, action], axis=1)
    x = jnp.maximum(x @ w1 + b1, 0.0)
    x = jnp.maximum(x @ w2 + b2, 0.0)
    return x @ w3 + b3


if __name__ == "__main__":
    key = jax.random.PRNGKey(0)
    k_s, k_a, k_p = jax.random.split(key, 3)

    batch, state_dim, action_dim = 64, 8, 4
    state = jax.random.normal(k_s, (batch, state_dim), jnp.float32)
    action = jax.random.normal(k_a, (batch, action_dim), jnp.float32)
    params = init_params(k_p, state_dim, action_dim)

    out = jax.jit(compute_r_hat)(state, action, params)
    out = jax.block_until_ready(out)

    assert out.shape == (batch, 1)
    ref16 = _reference_bf16(state, action, params)   # bit-comparable reference
    ref32 = _reference_f32(state, action, params)    # full-f32 sanity reference
    assert jnp.allclose(out, ref16, atol=1e-3, rtol=1e-3), \
        float(jnp.max(jnp.abs(out - ref16)))
    assert jnp.allclose(out, ref32, atol=3e-2, rtol=3e-2), \
        float(jnp.max(jnp.abs(out - ref32)))
    print("KERNEL_OK")
</pallas_src>

<mosaic_0001>
module attributes {stable_mosaic.version = 11 : i64} {
  func.func @_r_hat_kernel(%arg0: i32, %arg1: memref<32x8xbf16, #tpu.memory_space<vmem>>, %arg2: memref<32x4xbf16, #tpu.memory_space<vmem>>, %arg3: memref<8x512xbf16, #tpu.memory_space<vmem>>, %arg4: memref<4x512xbf16, #tpu.memory_space<vmem>>, %arg5: memref<1x512xf32, #tpu.memory_space<vmem>>, %arg6: memref<512x384xbf16, #tpu.memory_space<vmem>>, %arg7: memref<1x384xf32, #tpu.memory_space<vmem>>, %arg8: memref<1x384xf32, #tpu.memory_space<vmem>>, %arg9: memref<1xf32, #tpu.memory_space<smem>>, %arg10: memref<1x1x32xf32, #tpu.memory_space<vmem>>) attributes {dimension_semantics = [#tpu.dimension_semantics<parallel>], iteration_bounds = array<i64: 2>, scalar_prefetch = 0 : i64, scratch_operands = 0 : i64, tpu.core_type = #tpu.core_type<tc>, window_params = [{transform_indices = @transform_0, window_bounds = array<i64: 32, 8>}, {transform_indices = @transform_1, window_bounds = array<i64: 32, 4>}, {pipeline_mode = #tpu.pipeline_mode<synchronous>, transform_indices = @transform_2, window_bounds = array<i64: 8, 512>}, {pipeline_mode = #tpu.pipeline_mode<synchronous>, transform_indices = @transform_3, window_bounds = array<i64: 4, 512>}, {pipeline_mode = #tpu.pipeline_mode<synchronous>, transform_indices = @transform_4, window_bounds = array<i64: 1, 512>}, {pipeline_mode = #tpu.pipeline_mode<synchronous>, transform_indices = @transform_5, window_bounds = array<i64: 512, 384>}, {pipeline_mode = #tpu.pipeline_mode<synchronous>, transform_indices = @transform_6, window_bounds = array<i64: 1, 384>}, {pipeline_mode = #tpu.pipeline_mode<synchronous>, transform_indices = @transform_7, window_bounds = array<i64: 1, 384>}, {transform_indices = @transform_8, window_bounds = array<i64: 1>}, {transform_indices = @transform_9, window_bounds = array<i64: 1, 1, 32>}]} {
    %c0 = arith.constant 0 : index
    %c0_0 = arith.constant 0 : index
    %0 = vector.load %arg1[%c0, %c0_0] : memref<32x8xbf16, #tpu.memory_space<vmem>>, vector<32x8xbf16>
    %c0_1 = arith.constant 0 : index
    %c0_2 = arith.constant 0 : index
    %1 = vector.load %arg3[%c0_1, %c0_2] : memref<8x512xbf16, #tpu.memory_space<vmem>>, vector<8x512xbf16>
    %cst = arith.constant dense<0.000000e+00> : vector<32x512xf32>
    %2 = tpu.matmul %0, %1, %cst {dimension_numbers = #tpu.dot_dimension_numbers<[1], [0], [0], [1], [0, 0, 1, 1], [], []>} : vector<32x8xbf16>, vector<8x512xbf16>, vector<32x512xf32> -> vector<32x512xf32>
    %c0_3 = arith.constant 0 : index
    %c0_4 = arith.constant 0 : index
    %3 = vector.load %arg2[%c0_3, %c0_4] : memref<32x4xbf16, #tpu.memory_space<vmem>>, vector<32x4xbf16>
    %c0_5 = arith.constant 0 : index
    %c0_6 = arith.constant 0 : index
    %4 = vector.load %arg4[%c0_5, %c0_6] : memref<4x512xbf16, #tpu.memory_space<vmem>>, vector<4x512xbf16>
    %cst_7 = arith.constant dense<0.000000e+00> : vector<32x512xf32>
    %5 = tpu.matmul %3, %4, %cst_7 {dimension_numbers = #tpu.dot_dimension_numbers<[1], [0], [0], [1], [0, 0, 1, 1], [], []>} : vector<32x4xbf16>, vector<4x512xbf16>, vector<32x512xf32> -> vector<32x512xf32>
    %6 = arith.addf %2, %5 : vector<32x512xf32>
    %c0_8 = arith.constant 0 : index
    %c0_9 = arith.constant 0 : index
    %7 = vector.load %arg5[%c0_8, %c0_9] : memref<1x512xf32, #tpu.memory_space<vmem>>, vector<1x512xf32>
    %8 = vector.broadcast %7 : vector<1x512xf32> to vector<32x512xf32>
    %9 = arith.addf %6, %8 : vector<32x512xf32>
    %cst_10 = arith.constant 0.000000e+00 : f32
    %10 = vector.broadcast %cst_10 : f32 to vector<32x512xf32>
    %11 = arith.maximumf %9, %10 : vector<32x512xf32>
    %12 = arith.truncf %11 : vector<32x512xf32> to vector<32x512xbf16>
    %c0_11 = arith.constant 0 : index
    %c0_12 = arith.constant 0 : index
    %13 = vector.load %arg6[%c0_11, %c0_12] : memref<512x384xbf16, #tpu.memory_space<vmem>>, vector<512x384xbf16>
    %cst_13 = arith.constant dense<0.000000e+00> : vector<32x384xf32>
    %14 = tpu.matmul %12, %13, %cst_13 {dimension_numbers = #tpu.dot_dimension_numbers<[1], [0], [0], [1], [0, 0, 1, 1], [], []>} : vector<32x512xbf16>, vector<512x384xbf16>, vector<32x384xf32> -> vector<32x384xf32>
    %c0_14 = arith.constant 0 : index
    %c0_15 = arith.constant 0 : index
    %15 = vector.load %arg7[%c0_14, %c0_15] : memref<1x384xf32, #tpu.memory_space<vmem>>, vector<1x384xf32>
    %16 = vector.broadcast %15 : vector<1x384xf32> to vector<32x384xf32>
    %17 = arith.addf %14, %16 : vector<32x384xf32>
    %cst_16 = arith.constant 0.000000e+00 : f32
    %18 = vector.broadcast %cst_16 : f32 to vector<32x384xf32>
    %19 = arith.maximumf %17, %18 : vector<32x384xf32>
    %c0_17 = arith.constant 0 : index
    %c0_18 = arith.constant 0 : index
    %20 = vector.load %arg8[%c0_17, %c0_18] : memref<1x384xf32, #tpu.memory_space<vmem>>, vector<1x384xf32>
    %21 = vector.broadcast %20 : vector<1x384xf32> to vector<32x384xf32>
    %22 = arith.mulf %19, %21 : vector<32x384xf32>
    %cst_19 = arith.constant dense<0.000000e+00> : vector<32xf32>
    %23 = vector.multi_reduction <add>, %22, %cst_19 [1] : vector<32x384xf32> to vector<32xf32>
    %c0_20 = arith.constant 0 : index
    %24 = memref.load %arg9[%c0_20] : memref<1xf32, #tpu.memory_space<smem>>
    %25 = vector.broadcast %24 : f32 to vector<32xf32>
    %26 = arith.addf %23, %25 : vector<32xf32>
    %27 = vector.shape_cast %26 : vector<32xf32> to vector<1x1x32xf32>
    %c0_21 = arith.constant 0 : index
    %c0_22 = arith.constant 0 : index
    %c0_23 = arith.constant 0 : index
    %28 = vector.load %arg10[%c0_21, %c0_22, %c0_23] : memref<1x1x32xf32, #tpu.memory_space<vmem>>, vector<1x1x32xf32>
    tpu.vector_store %arg10[%c0_21, %c0_22, %c0_23], %27 {strides = array<i32>} : memref<1x1x32xf32, #tpu.memory_space<vmem>>, vector<1x1x32xf32>,
    return
  }
  func.func @transform_0(%arg0: i32) -> (i32, i32) {
    %c0_i32 = arith.constant 0 : i32
    %c0_i32_0 = arith.constant 0 : i32
    return %arg0, %c0_i32 : i32, i32
  }
  func.func @transform_1(%arg0: i32) -> (i32, i32) {
    %c0_i32 = arith.constant 0 : i32
    %c0_i32_0 = arith.constant 0 : i32
    return %arg0, %c0_i32 : i32, i32
  }
  func.func @transform_2(%arg0: i32) -> (i32, i32) {
    %c0_i32 = arith.constant 0 : i32
    %c0_i32_0 = arith.constant 0 : i32
    %c0_i32_1 = arith.constant 0 : i32
    return %c0_i32, %c0_i32_0 : i32, i32
  }
  func.func @transform_3(%arg0: i32) -> (i32, i32) {
    %c0_i32 = arith.constant 0 : i32
    %c0_i32_0 = arith.constant 0 : i32
    %c0_i32_1 = arith.constant 0 : i32
    return %c0_i32, %c0_i32_0 : i32, i32
  }
  func.func @transform_4(%arg0: i32) -> (i32, i32) {
    %c0_i32 = arith.constant 0 : i32
    %c0_i32_0 = arith.constant 0 : i32
    %c0_i32_1 = arith.constant 0 : i32
    return %c0_i32, %c0_i32_0 : i32, i32
  }
  func.func @transform_5(%arg0: i32) -> (i32, i32) {
    %c0_i32 = arith.constant 0 : i32
    %c0_i32_0 = arith.constant 0 : i32
    %c0_i32_1 = arith.constant 0 : i32
    return %c0_i32, %c0_i32_0 : i32, i32
  }
  func.func @transform_6(%arg0: i32) -> (i32, i32) {
    %c0_i32 = arith.constant 0 : i32
    %c0_i32_0 = arith.constant 0 : i32
    %c0_i32_1 = arith.constant 0 : i32
    return %c0_i32, %c0_i32_0 : i32, i32
  }
  func.func @transform_7(%arg0: i32) -> (i32, i32) {
    %c0_i32 = arith.constant 0 : i32
    %c0_i32_0 = arith.constant 0 : i32
    %c0_i32_1 = arith.constant 0 : i32
    return %c0_i32, %c0_i32_0 : i32, i32
  }
  func.func @transform_8(%arg0: i32) -> i32 {
    %c0_i32 = arith.constant 0 : i32
    %c0_i32_0 = arith.constant 0 : i32
    return %c0_i32 : i32
  }
  func.func @transform_9(%arg0: i32) -> (i32, i32, i32) {
    %c0_i32 = arith.constant 0 : i32
    %c0_i32_0 = arith.constant 0 : i32
    %c0_i32_1 = arith.constant 0 : i32
    return %arg0, %c0_i32, %c0_i32_0 : i32, i32, i32
  }
}

</mosaic_0001>

<bundles_post_ra>
// kernel: compute_r_hat.1
= control target key start
LH: loop header
LB: loop body
LE: loop exit
PB: predicated region body
PF: predicated region fallthrough
CT: control target
= control target key end

     0   :  { %s2170_s11 = smov 0   ;;  %s2565_s0 = inlined_call_operand.vmem [shape: bf16[64,8], index: 0, kind: input, shape index: {}]   ;;  %s2566_s1 = inlined_call_operand.vmem [shape: bf16[64,4], index: 1, kind: input, shape index: {}]   ;;  %s2567_s2 = inlined_call_operand.vmem [shape: bf16[8,512], index: 2, kind: input, shape index: {}]   ;;  %s2568_s3 = inlined_call_operand.vmem [shape: bf16[4,512], index: 3, kind: input, shape index: {}]   ;;  %s2569_s4 = inlined_call_operand.vmem [shape: f32[1,512], index: 4, kind: input, shape index: {}]   ;;  %s2570_s5 = inlined_call_operand.vmem [shape: bf16[512,384], index: 5, kind: input, shape index: {}]   ;;  %s2571_s6 = inlined_call_operand.vmem [shape: f32[1,384], index: 6, kind: input, shape index: {}]   ;;  %s2572_s7 = inlined_call_operand.vmem [shape: f32[1,384], index: 7, kind: input, shape index: {}]   ;;  %s2573_s8 = inlined_call_operand.<no memory space> [shape: f32[1], index: 8, kind: input, shape index: {}]   ;;  %s2574_s9 = inlined_call_operand.vmem [shape: f32[2,1,32], index: 9, kind: output, shape index: {}]  }
   0x1   :  { %14 = sst [smem:[#allocation2]] %s2573_s8 }
   0x2 LB: > { %s2176_s12 = sadd.s32 4294967295, %s2113_s11   ;;  %p1749_p0 = scmp.ge.s32.totalorder %s2113_s11, 1  ;;  %s2113_s11 = sphi %s2170_s11, %s20_s11  }
   0x3   : > { %p300_p1 = scmp.lt.s32.totalorder %s2113_s11, 3 }
   0x5   : > { %p301_p2 = pnand %p1749_p0, %p300_p1 }
   0x6   : > { %v381_v0 = vlaneseq (!%p301_p2)  ;;  %s1750_s13 = sshll.u32 (!%p301_p2), %s2176_s12, 2  ;;  %v365_v1 = vld [vmem:[%s2568_s3] sm:$0xff] (!%p301_p2)  ;;  %v2115_v2 = vmov (!%p301_p2), 1983009808   ;;  %v2116_v4 = vmov (!%p301_p2), 0   ;;  %vm401_vm0 = vcmask (!%p301_p2), 1041408  }
   0x7   : > { %304 = sbr.rel (%p301_p2) target bundleno = 722 (0x2d2), region = 56  ;;  %v379_v3 = vunpack.c.l.s4 (!%p301_p2), %v2115_v2  ;;  %446 = vmatprep.mubr.bf16.mxu1 (!%p301_p2), %v2116_v4  ;;  %p340_p3 = scmp.lt.s32.totalorder (!%p301_p2), %s1750_s13, 7  ;;  %v1979_v6 = vld [vmem:[%s2570_s5 + $0x4] ss:$12 sps:$4 sm:$0xff] (!%p301_p2)   ;;  %v377_v7 = vcombine.high (!%p301_p2), %v365_v1, %v365_v1  ;;  %v1981_v9 = vld [vmem:[%s2570_s5] ss:$12 sps:$4 sm:$0xff] (!%p301_p2)  }
   0x8   : > { %v2186_v5 = vshrl.u32 (!%p301_p2), %v381_v0, 7  ;;  %v1982_v10 = vld [vmem:[%s2570_s5 + $0x1c] ss:$12 sps:$4 sm:$0xff] (!%p301_p2)   ;;  %1385 = vmatprep.subr.bf16.mxu0 (!%p301_p2), %v1979_v6  ;;  %v1984_v12 = vld [vmem:[%s2570_s5 + $0x18] ss:$12 sps:$4 sm:$0xff] (!%p301_p2)   ;;  %vm394_vm1 = vcmask (!%p301_p2), 31744  }
   0x9   : > { %v380_v8 = vunpack.c.0.s8 (!%p301_p2), %v379_v3  ;;  %1386 = vmatpush1.bf16.msra.mxu0 (!%p301_p2), %v1981_v9  ;;  %v1985_v13 = vld [vmem:[%s2570_s5 + $0x34] ss:$12 sps:$4 sm:$0xff] (!%p301_p2)   ;;  %v1987_v16 = vld [vmem:[%s2570_s5 + $0x30] ss:$12 sps:$4 sm:$0xff] (!%p301_p2)   ;;  %v1988_v21 = vld [vmem:[%s2570_s5 + $0x4c] ss:$12 sps:$4 sm:$0xff] (!%p301_p2)  }
   0xa   : > { %1387 = vmatprep.subr.bf16.mxu0 (!%p301_p2), %v1982_v10  ;;  %v359_v20 = vld [vmem:[%s2567_s2] sm:$0xff] (!%p301_p2)  ;;  %v1990_v25 = vld [vmem:[%s2570_s5 + $0x48] ss:$12 sps:$4 sm:$0xff] (!%p301_p2)   ;;  %vm547_vm2 = vcmask (!%p301_p2), 1043456   ;;  %v1999_v34 = vld [vmem:[%s2570_s5 + $0x90] ss:$12 sps:$4 sm:$0xff] (!%p301_p2)  }
   0xb   : > { %v383_v11 = vsub.s32 (!%p301_p2), %v380_v8, %v2186_v5  ;;  %v1765_v24 = vcombine.high (!%p301_p2), %v359_v20, %v359_v20  ;;  %v1991_v26 = vld [vmem:[%s2570_s5 + $0x64] ss:$12 sps:$4 sm:$0xff] (!%p301_p2)   ;;  %v1993_v27 = vld [vmem:[%s2570_s5 + $0x60] ss:$12 sps:$4 sm:$0xff] (!%p301_p2)   ;;  %v1994_v28 = vld [vmem:[%s2570_s5 + $0x7c] ss:$12 sps:$4 sm:$0xff] (!%p301_p2)   ;;  %v1764_v32 = vcombine.low (!%p301_p2), %v359_v20, %v359_v20 }
   0xc   : > { %v1996_v30 = vld [vmem:[%s2570_s5 + $0x78] ss:$12 sps:$4 sm:$0xff] (!%p301_p2)   ;;  %v1997_v31 = vld [vmem:[%s2570_s5 + $0x94] ss:$12 sps:$4 sm:$0xff] (!%p301_p2)   ;;  %v360_v33 = vld [vmem:[%s2567_s2 + $0x8] sm:$0xff] (!%p301_p2)  ;;  %vm540_vm3 = vcmask (!%p301_p2), 64512  }
   0xd   : > { %v384_v14 = vrot.slane (!%p301_p2), %v365_v1, %v383_v11  ;;  %v391_v15 = vrot.slane (!%p301_p2), %v377_v7, %v383_v11  ;;  %1388 = vmatpush1.bf16.msra.mxu0 (!%p301_p2), %v1984_v12  ;;  %v2000_v35 = vld [vmem:[%s2570_s5 + $0xac] ss:$12 sps:$4 sm:$0xff] (!%p301_p2)   ;;  %v549_v36 = vsel (!%p301_p2), %vm547_vm2, %v1764_v32, 0  ;;  %v1767_v37 = vcombine.high (!%p301_p2), %v360_v33, %v360_v33  ;;  %v2002_v38 = vld [vmem:[%s2570_s5 + $0xa8] ss:$12 sps:$4 sm:$0xff] (!%p301_p2)   ;;  %s1646_s27 = sld [smem:[#allocation2]] (!%p301_p2) }
   0xe   : > { %s2576_s13 = smov (!%p340_p3, %s1750_s13), 7  ;;  %1389 = vmatprep.subr.bf16.mxu0 %v1985_v13  ;;  %v2003_v39 = vld [vmem:[%s2570_s5 + $0xc4] ss:$12 sps:$4 sm:$0xff]   ;;  %v2006_v40 = vld [vmem:[%s2570_s5 + $0xc0] ss:$12 sps:$4 sm:$0xff]   ;;  %v1766_v47 = vcombine.low %v360_v33, %v360_v33  ;;  %p351_p4 = scmp.lt.s32.totalorder %s2176_s12, 1 }
   0xf   : > { %s1751_s21 = sshll.u32 %s2576_s13, 2  ;;  %v392_v17 = vcombine.high %v384_v14, %v384_v14  ;;  %v403_v18 = vsel %vm401_vm0, %v384_v14, 0  ;;  %v393_v19 = vcombine.high %v391_v15, %v391_v15  ;;  %v409_v23 = vsel %vm401_vm0, %v391_v15, 0  ;;  %v2008_v41 = vld [vmem:[%s2570_s5 + $0xdc] ss:$12 sps:$4 sm:$0xff]  }
  0x10   : > { %s2204_s26 = scalar_lea.vmem %s2566_s1, %s1751_s21  ;;  %s2212_s10 = scalar_lea.vmem %s2565_s0, %s1751_s21  ;;  %v2011_v42 = vld [vmem:[%s2570_s5 + $0xd8] ss:$12 sps:$4 sm:$0xff]   ;;  %v2013_v43 = vld [vmem:[%s2570_s5 + $0xf4] ss:$12 sps:$4 sm:$0xff]   ;;  %v2016_v44 = vld [vmem:[%s2570_s5 + $0xf0] ss:$12 sps:$4 sm:$0xff]  }
  0x11   : > { %1756 = vmatprep.subr.msk.bf16.mxu1 %vm401_vm0, %v392_v17  ;;  %v1971_v22 = vld [vmem:[%s2204_s26] sm:$0xff]   ;;  %1390 = vmatpush1.bf16.msra.mxu0 %v1987_v16  ;;  %v1972_v29 = vld [vmem:[%s2204_s26 + $0x8] sm:$0xff]   ;;  %v555_v51 = vsel %vm547_vm2, %v1766_v47, 0  ;;  %v2020_v61 = vld [vmem:[%s2570_s5 + $0x110] ss:$12 sps:$4 sm:$0xff]   ;;  %v2383_v15 = vsub.s32 0, %v2186_v5 }
  0x12   : > { %415 = vmatpush1.bf16.msra.mxu1 %v403_v18  ;;  %1391 = vmatprep.subr.bf16.mxu0 %v1988_v21  ;;  %v2018_v45 = vld [vmem:[%s2570_s5 + $0x10c] ss:$12 sps:$4 sm:$0xff]   ;;  %v1975_v46 = vld [vmem:[%s2212_s10] sm:$0xff]   ;;  %v2005_v48 = vld [vmem:[%s2570_s5 + $0xc8] ss:$12 sps:$4 sm:$0xff]   ;;  %v2389_v17 = vsub.s32 1, %v2186_v5 }
  0x13   : > { %1759 = vmatprep.subr.msk.bf16.mxu1 %vm401_vm0, %v393_v19  ;;  %v2021_v49 = vld [vmem:[%s2570_s5 + $0x108] ss:$12 sps:$4 sm:$0xff]   ;;  %v2023_v50 = vld [vmem:[%s2570_s5 + $0x124] ss:$12 sps:$4 sm:$0xff]   ;;  %v2026_v52 = vld [vmem:[%s2570_s5 + $0x120] ss:$12 sps:$4 sm:$0xff]  }
  0x14   : > { %v2028_v53 = vld [vmem:[%s2570_s5 + $0x13c] ss:$12 sps:$4 sm:$0xff]   ;;  %v2031_v55 = vld [vmem:[%s2570_s5 + $0x138] ss:$12 sps:$4 sm:$0xff]   ;;  %v2010_v57 = vld [vmem:[%s2570_s5 + $0xe0] ss:$12 sps:$4 sm:$0xff]  }
  0x15   : > { %1757 = vmatmul.mubr.msk.bf16.vlgmr.msra.gmra.mrb[0].mxu1 %vm394_vm1, %v1971_v22  ;;  %1392 = vmatpush1.bf16.msra.mxu0 %v1990_v25  ;;  %v1976_v54 = vld [vmem:[%s2212_s10 + $0x8] sm:$0xff]   ;;  %v2015_v59 = vld [vmem:[%s2570_s5 + $0xf8] ss:$12 sps:$4 sm:$0xff]   ;;  %v2022_v62 = vld [vmem:[%s2570_s5 + $0x50] ss:$12 sps:$4 sm:$0xff]   ;;  %s2578_s12 = smov (!%p351_p4, %s2176_s12), 1 }
  0x16   : > { %468 = vmatpush1.bf16.msra.mxu1 %v409_v23  ;;  %456 = vmatprep.mubr.bf16.mxu1 %v2116_v4  ;;  %v2007_v56 = vld [vmem:[%s2570_s5 + $0x8] ss:$12 sps:$4 sm:$0xff]   ;;  %v2012_v58 = vld [vmem:[%s2570_s5 + $0x20] ss:$12 sps:$4 sm:$0xff]   ;;  %v2017_v60 = vld [vmem:[%s2570_s5 + $0x38] ss:$12 sps:$4 sm:$0xff]   ;;  %s353_s10 = scalar_lea.vmem %s2574_s9, %s2578_s12 }
  0x17   : > { %1768 = vmatprep.subr.msk.bf16.mxu1 %vm547_vm2, %v1765_v24  ;;  %1393 = vmatprep.subr.bf16.mxu0 %v1991_v26  ;;  %v2025_v63 = vld [vmem:[%s2570_s5 + $0x128] ss:$12 sps:$4 sm:$0xff]   ;;  %v2030_v2 = vld [vmem:[%s2570_s5 + $0x140] ss:$12 sps:$4 sm:$0xff]   ;;  %v2035_v6 = vld [vmem:[%s2570_s5 + $0x158] ss:$12 sps:$4 sm:$0xff]  }
  0x18   : > { %v2027_v1 = vld [vmem:[%s2570_s5 + $0x68] ss:$12 sps:$4 sm:$0xff]   ;;  %v2032_v3 = vld [vmem:[%s2570_s5 + $0x80] ss:$12 sps:$4 sm:$0xff]   ;;  %v2036_v7 = vld [vmem:[%s2570_s5 + $0x150] ss:$12 sps:$4 sm:$0xff]  }
  0x19   : > { %1394 = vmatpush1.bf16.msra.mxu0 %v1993_v27  ;;  %v2037_v8 = vld [vmem:[%s2570_s5 + $0x98] ss:$12 sps:$4 sm:$0xff]   ;;  %v2040_v10 = vld [vmem:[%s2570_s5 + $0x170] ss:$12 sps:$4 sm:$0xff]   ;;  %v2041_v11 = vld [vmem:[%s2570_s5 + $0x168] ss:$12 sps:$4 sm:$0xff]  }
  0x1a   : > { %1395 = vmatprep.subr.bf16.mxu0 %v1994_v28  ;;  %v2038_v9 = vld [vmem:[%s2570_s5 + $0x16c] ss:$12 sps:$4 sm:$0xff]   ;;  %v2042_v12 = vld [vmem:[%s2570_s5 + $0xb0] ss:$12 sps:$4 sm:$0xff]   ;;  %v2046_v14 = vld [vmem:[%s2570_s5 + $0x248] ss:$12 sps:$4 sm:$0xff]  }
  0x1b   : > { %v2045_v13 = vld [vmem:[%s2570_s5 + $0x184] ss:$12 sps:$4 sm:$0xff]   ;;  %v666_v16 = vld [vmem:[%s2569_s4] sm:$0xf]  ;;  %vm1667_vm4 = vcmask 130112   ;;  %vm1674_vm5 = vcmask 195712  }
  0x1c   : > { %v671_v18 = vrot.slane %v666_v16, %v2383_v15  ;;  %v675_v19 = vrot.slane %v666_v16, %v2389_v17  ;;  %vm1681_vm6 = vcmask 261312   ;;  %vm1684_vm7 = vcmask 253952  }
  0x1d   : > { %1758 = vmatmul.mubr.msk.bf16.gmra.mrb[4].mxu1 %vm394_vm1, %v1972_v29  ;;  %1396 = vmatpush1.bf16.msra.mxu0 %v1996_v30 }
  0x1e   : > { %499 = vmatprep.mubr.bf16.mxu1 %v2116_v4  ;;  %1397 = vmatprep.subr.bf16.mxu0 %v1997_v31 }
  0x21   : > { %1398 = vmatpush1.bf16.msra.mxu0 %v1999_v34 }
  0x22   : > { %1399 = vmatprep.subr.bf16.mxu0 %v2000_v35  ;;  %v2043_v35 = vld [vmem:[%s2570_s5 + $0x180] ss:$12 sps:$4 sm:$0xff]  }
  0x25   : > { %1760 = vmatmul.mubr.msk.bf16.vlgmr.msra.gmra.mrb[8].mxu1 %vm394_vm1, %v1971_v22  ;;  %1400 = vmatpush1.bf16.msra.mxu0 %v2002_v38 }
  0x26   : > { %561 = vmatpush1.bf16.msra.mxu1 %v549_v36  ;;  %509 = vmatprep.mubr.bf16.mxu1 %v2116_v4  ;;  %v2047_v36 = vld [vmem:[%s2570_s5 + $0x188] ss:$12 sps:$4 sm:$0xff]  }
  0x27   : > { %1771 = vmatprep.subr.msk.bf16.mxu1 %vm547_vm2, %v1767_v37  ;;  %1401 = vmatprep.subr.bf16.mxu0 %v2003_v39  ;;  %v2050_v39 = vld [vmem:[%s2570_s5 + $0x19c] ss:$12 sps:$4 sm:$0xff]  }
  0x29   : > { %1402 = vmatpush1.bf16.msra.mxu0 %v2006_v40  ;;  %v2051_v40 = vld [vmem:[%s2570_s5 + $0x260] ss:$12 sps:$4 sm:$0xff]  }
  0x2a   : > { %1403 = vmatprep.subr.bf16.mxu0 %v2008_v41  ;;  %v2406_v41 = vsub.s32 2, %v2186_v5 }
  0x2d   : > { %1761 = vmatmul.mubr.msk.bf16.gmra.mrb[12].mxu1 %vm394_vm1, %v1972_v29  ;;  %1404 = vmatpush1.bf16.msra.mxu0 %v2011_v42 }
  0x2e   : > { %592 = vmatprep.mubr.bf16.mxu1 %v2116_v4  ;;  %1405 = vmatprep.subr.bf16.mxu0 %v2013_v43 }
  0x31   : > { %1406 = vmatpush1.bf16.msra.mxu0 %v2016_v44  ;;  %v682_v44 = vsub.s32 3, %v2186_v5 }
  0x32   : > { %1407 = vmatprep.subr.bf16.mxu0 %v2018_v45 }
  0x35   : > { %1769 = vmatmul.mubr.msk.bf16.vlgmr.msra.gmra.mrb[0].mxu1 %vm540_vm3, %v1975_v46  ;;  %1408 = vmatpush1.bf16.msra.mxu0 %v2021_v49  ;;  %v2052_v49 = vld [vmem:[%s2570_s5 + $0x1a0] ss:$12 sps:$4 sm:$0xff]  }
  0x36   : > { %602 = vmatprep.mubr.bf16.mxu1 %v2116_v4  ;;  %614 = vmatpush1.bf16.msra.mxu1 %v555_v51 }
  0x37   : > { %1872 = vmatprep.subr.bf16.mxu1 %v2005_v48  ;;  %1409 = vmatprep.subr.bf16.mxu0 %v2023_v50  ;;  %v2048_v48 = vld [vmem:[%s2570_s5 + $0x198] ss:$12 sps:$4 sm:$0xff]  }
  0x39   : > { %1410 = vmatpush1.bf16.msra.mxu0 %v2026_v52  ;;  %v679_v52 = vrot.slane %v666_v16, %v2406_v41 }
  0x3a   : > { %1411 = vmatprep.subr.bf16.mxu0 %v2028_v53  ;;  %v2055_v53 = vld [vmem:[%s2570_s5 + $0x1b4] ss:$12 sps:$4 sm:$0xff]  }
  0x3d   : > { %1770 = vmatmul.mubr.msk.bf16.gmra.mrb[4].mxu1 %vm540_vm3, %v1976_v54  ;;  %1412 = vmatpush1.bf16.msra.mxu0 %v2031_v55 }
  0x3e   : > { %645 = vmatprep.mubr.bf16.mxu1 %v2116_v4 }
  0x45   : > { %1772 = vmatmul.mubr.msk.bf16.vlgmr.msra.gmra.mrb[8].mxu1 %vm540_vm3, %v1975_v46 }
  0x46   : > { %655 = vmatprep.mubr.bf16.mxu1 %v2116_v4  ;;  %1873 = vmatpush3.bf16.msra.mxu1 %v2007_v56  ;;  %v2033_v4 = vld [vmem:[%s2570_s5 + $0x154] ss:$12 sps:$4 sm:$0xff]  }
  0x47   : > { %1874 = vmatprep.subr.bf16.mxu1 %v2010_v57  ;;  %1413 = vmatprep.subr.bf16.mxu0 %v2033_v4  ;;  %v683_v57 = vrot.slane %v666_v16, %v682_v44  ;;  %v2066_v16 = vld [vmem:[%s2570_s5 + $0x2a8] ss:$12 sps:$4 sm:$0xff]  }
  0x48   : > { %1414 = vmatpush1.bf16.msra.mxu0 %v2036_v7 }
  0x49   : > { %1415 = vmatprep.subr.bf16.mxu0 %v2038_v9 }
  0x4a   : > { %1875 = vmatpush3.bf16.msra.mxu1 %v2012_v58 }
  0x4b   : > { %1876 = vmatprep.subr.bf16.mxu1 %v2015_v59 }
  0x4c   : > { %1416 = vmatpush1.bf16.msra.mxu0 %v2041_v11  ;;  %v2062_v11 = vld [vmem:[%s2570_s5 + $0x1d0] ss:$12 sps:$4 sm:$0xff]  }
  0x4d   : > { %1773 = vmatmul.mubr.msk.bf16.gmra.mrb[12].mxu1 %vm540_vm3, %v1976_v54  ;;  %1438 = vmatprep.subr.bf16.mxu0 %v2045_v13  ;;  %v2056_v54 = vld [vmem:[%s2570_s5 + $0x278] ss:$12 sps:$4 sm:$0xff]  }
  0x4e   : > { %1877 = vmatpush3.bf16.msra.mxu1 %v2017_v60 }
  0x4f   : > { %1878 = vmatprep.subr.bf16.mxu1 %v2020_v61  ;;  %v2053_v61 = vld [vmem:[%s2570_s5 + $0x1b0] ss:$12 sps:$4 sm:$0xff]  }
  0x52   : > { %1879 = vmatpush3.bf16.msra.mxu1 %v2022_v62  ;;  %v2057_v62 = vld [vmem:[%s2570_s5 + $0x1b8] ss:$12 sps:$4 sm:$0xff]  }
  0x53   : > { %1880 = vmatprep.subr.bf16.mxu1 %v2025_v63 }
  0x56   : > { %1881 = vmatpush3.bf16.msra.mxu1 %v2027_v1 }
  0x57   : > { %1882 = vmatprep.subr.bf16.mxu1 %v2030_v2  ;;  %v2060_v2 = vld [vmem:[%s2570_s5 + $0x1cc] ss:$12 sps:$4 sm:$0xff]  }
  0x5a   : > { %1883 = vmatpush3.bf16.msra.mxu1 %v2032_v3  ;;  %v2061_v3 = vld [vmem:[%s2570_s5 + $0x290] ss:$12 sps:$4 sm:$0xff]  }
  0x5b   : > { %1884 = vmatprep.subr.bf16.mxu1 %v2035_v6 }
  0x5e   : > { %1885 = vmatpush3.bf16.msra.mxu1 %v2037_v8 }
  0x5f   : > { %1886 = vmatprep.subr.bf16.mxu1 %v2040_v10  ;;  %v2058_v10 = vld [vmem:[%s2570_s5 + $0x1c8] ss:$12 sps:$4 sm:$0xff]  }
  0x62   : > { %1887 = vmatpush3.bf16.msra.mxu1 %v2042_v12 }
  0x63   : > { %1900 = vmatprep.subr.bf16.mxu1 %v2046_v14  ;;  %v2065_v14 = vld [vmem:[%s2570_s5 + $0x1e4] ss:$12 sps:$4 sm:$0xff]  }
 0x108   : > { %v594_v20 = vpop.f32.mrb[0].mxu1 }
 0x109   : > { %v688_v21 = vadd.f32 %v671_v18, %v594_v20  ;;  %v596_v22 = vpop.f32.mrb[1].mxu1 }
 0x10a   : > { %v689_v23 = vadd.f32 %v675_v19, %v596_v22  ;;  %v598_v24 = vpop.f32.mrb[2].mxu1 }
 0x10b   : > { %v692_v25 = vadd.f32 %v671_v18, %v598_v24  ;;  %v600_v26 = vpop.f32.mrb[3].mxu1  ;;  %v704_v28 = vmax.f32 %v688_v21, 0.0  ;;  %v2067_v24 = vld [vmem:[%s2570_s5 + $0x1e8] ss:$12 sps:$4 sm:$0xff]  }
 0x10c   : > { %v693_v27 = vadd.f32 %v675_v19, %v600_v26  ;;  %v705_v30 = vmax.f32 %v689_v23, 0.0  ;;  %v2063_v23 = vld [vmem:[%s2570_s5 + $0x1e0] ss:$12 sps:$4 sm:$0xff]  }
 0x10d   : > { %v708_v29 = vmax.f32 %v692_v25, 0.0 }
 0x10e   : > { %v709_v31 = vmax.f32 %v693_v27, 0.0  ;;  %v2070_v27 = vld [vmem:[%s2570_s5 + $0x1fc] ss:$12 sps:$4 sm:$0xff]  }
 0x10f   : > { %v720_v32 = vpack.c.bf16 %v708_v29, %v704_v28  ;;  %v2071_v28 = vld [vmem:[%s2570_s5 + $0x2c0] ss:$12 sps:$4 sm:$0xff]  }
 0x110   : > { %v604_v33 = vpop.f32.mrb[4].mxu1  ;;  %v721_v34 = vpack.c.bf16 %v709_v31, %v705_v30 }
 0x111   : > { %v696_v37 = vadd.f32 %v671_v18, %v604_v33  ;;  %v606_v38 = vpop.f32.mrb[5].mxu1 }
 0x112   : > { %v697_v42 = vadd.f32 %v675_v19, %v606_v38  ;;  %v608_v43 = vpop.f32.mrb[6].mxu1  ;;  %1417 = vmatprep.mubr.bf16.mxu0 %v721_v34  ;;  %1523 = vmatprep.mubr.bf16.mxu1 %v721_v34  ;;  %v2068_v34 = vld [vmem:[%s2570_s5 + $0x1f8] ss:$12 sps:$4 sm:$0xff]   ;;  %v2075_v38 = vld [vmem:[%s2570_s5 + $0x214] ss:$12 sps:$4 sm:$0xff]  }
 0x113   : > { %v700_v45 = vadd.f32 %v671_v18, %v608_v43  ;;  %v610_v46 = vpop.f32.mrb[7].mxu1  ;;  %1418 = vmatmul.mubr.bf16.vlgmr.msra.gmra.mrb[0].mxu0 %v720_v32  ;;  %1524 = vmatmul.mubr.bf16.vlgmr.msra.gmra.mrb[16].mxu1 %v720_v32  ;;  %v712_v50 = vmax.f32 %v696_v37, 0.0 }
 0x114   : > { %v701_v47 = vadd.f32 %v675_v19, %v610_v46  ;;  %1439 = vmatpush1.bf16.msra.mxu0 %v2043_v35  ;;  %1901 = vmatpush3.bf16.msra.mxu1 %v2047_v36  ;;  %v713_v55 = vmax.f32 %v697_v42, 0.0  ;;  %v2072_v35 = vld [vmem:[%s2570_s5 + $0x200] ss:$12 sps:$4 sm:$0xff]   ;;  %v2077_v46 = vld [vmem:[%s2570_s5 + $0x218] ss:$12 sps:$4 sm:$0xff]  }
 0x115   : > { %v716_v51 = vmax.f32 %v700_v45, 0.0  ;;  %1440 = vmatprep.subr.bf16.mxu0 %v2050_v39  ;;  %1902 = vmatprep.subr.bf16.mxu1 %v2051_v40  ;;  %v2076_v39 = vld [vmem:[%s2570_s5 + $0x2d8] ss:$12 sps:$4 sm:$0xff]   ;;  %v2073_v45 = vld [vmem:[%s2570_s5 + $0x210] ss:$12 sps:$4 sm:$0xff]  }
 0x116   : > { %v717_v56 = vmax.f32 %v701_v47, 0.0  ;;  %v2080_v47 = vld [vmem:[%s2570_s5 + $0x22c] ss:$12 sps:$4 sm:$0xff]  }
 0x117   : > { %v724_v58 = vpack.c.bf16 %v716_v51, %v712_v50  ;;  %v2082_v50 = vld [vmem:[%s2570_s5 + $0x230] ss:$12 sps:$4 sm:$0xff]  }
 0x118   : > { %v725_v59 = vpack.c.bf16 %v717_v56, %v713_v55  ;;  %1441 = vmatpush1.bf16.msra.mxu0 %v2048_v48  ;;  %1903 = vmatpush3.bf16.msra.mxu1 %v2052_v49  ;;  %v647_v60 = vpop.f32.mrb[8].mxu1  ;;  %v2081_v48 = vld [vmem:[%s2570_s5 + $0x2f0] ss:$12 sps:$4 sm:$0xff]   ;;  %v2078_v49 = vld [vmem:[%s2570_s5 + $0x228] ss:$12 sps:$4 sm:$0xff]  }
 0x119   : > { %v690_v63 = vadd.f32 %v679_v52, %v647_v60  ;;  %v649_v1 = vpop.f32.mrb[9].mxu1  ;;  %1442 = vmatprep.subr.bf16.mxu0 %v2055_v53  ;;  %1904 = vmatprep.subr.bf16.mxu1 %v2056_v54  ;;  %v2085_v51 = vld [vmem:[%s2570_s5 + $0x244] ss:$12 sps:$4 sm:$0xff]   ;;  %v2088_v53 = vld [vmem:[%s2570_s5 + $0x25c] ss:$12 sps:$4 sm:$0xff]  }
 0x11a   : > { %v691_v4 = vadd.f32 %v683_v57, %v649_v1  ;;  %v651_v6 = vpop.f32.mrb[10].mxu1  ;;  %1427 = vmatprep.mubr.bf16.mxu0 %v725_v59  ;;  %1531 = vmatprep.mubr.bf16.mxu1 %v725_v59  ;;  %v2086_v54 = vld [vmem:[%s2570_s5 + $0x258] ss:$12 sps:$4 sm:$0xff]   ;;  %v2091_v55 = vld [vmem:[%s2570_s5 + $0x274] ss:$12 sps:$4 sm:$0xff]  }
 0x11b   : > { %v694_v7 = vadd.f32 %v679_v52, %v651_v6  ;;  %v653_v8 = vpop.f32.mrb[11].mxu1  ;;  %1428 = vmatmul.mubr.bf16.gmra.mrb[4].mxu0 %v724_v58  ;;  %1532 = vmatmul.mubr.bf16.gmra.mrb[20].mxu1 %v724_v58  ;;  %v706_v12 = vmax.f32 %v690_v63, 0.0  ;;  %v2089_v56 = vld [vmem:[%s2570_s5 + $0x270] ss:$12 sps:$4 sm:$0xff]   ;;  %v2092_v58 = vld [vmem:[%s2570_s5 + $0x288] ss:$12 sps:$4 sm:$0xff]  }
 0x11c   : > { %v695_v9 = vadd.f32 %v683_v57, %v653_v8  ;;  %1443 = vmatpush1.bf16.msra.mxu0 %v2053_v61  ;;  %1905 = vmatpush3.bf16.msra.mxu1 %v2057_v62  ;;  %v707_v18 = vmax.f32 %v691_v4, 0.0  ;;  %v2097_v59 = vld [vmem:[%s2570_s5 + $0x2a4] ss:$12 sps:$4 sm:$0xff]   ;;  %v2095_v60 = vld [vmem:[%s2570_s5 + $0x2a0] ss:$12 sps:$4 sm:$0xff]  }
 0x11d   : > { %v710_v13 = vmax.f32 %v694_v7, 0.0  ;;  %1444 = vmatprep.subr.bf16.mxu0 %v2060_v2  ;;  %1906 = vmatprep.subr.bf16.mxu1 %v2061_v3  ;;  %v2100_v61 = vld [vmem:[%s2570_s5 + $0x2bc] ss:$12 sps:$4 sm:$0xff]   ;;  %v2098_v62 = vld [vmem:[%s2570_s5 + $0x2b8] ss:$12 sps:$4 sm:$0xff]  }
 0x11e   : > { %v711_v19 = vmax.f32 %v695_v9, 0.0  ;;  %v2103_v63 = vld [vmem:[%s2570_s5 + $0x2d4] ss:$12 sps:$4 sm:$0xff]   ;;  %v2101_v1 = vld [vmem:[%s2570_s5 + $0x2d0] ss:$12 sps:$4 sm:$0xff]  }
 0x11f   : > { %v2446_v20 = vpack.c.bf16 %v710_v13, %v706_v12  ;;  %v2106_v2 = vld [vmem:[%s2570_s5 + $0x2ec] ss:$12 sps:$4 sm:$0xff]   ;;  %v2104_v3 = vld [vmem:[%s2570_s5 + $0x2e8] ss:$12 sps:$4 sm:$0xff]  }
 0x120   : > { %v723_v21 = vpack.c.bf16 %v711_v19, %v707_v18  ;;  %1445 = vmatpush1.bf16.msra.mxu0 %v2058_v10  ;;  %1907 = vmatpush3.bf16.msra.mxu1 %v2062_v11  ;;  %v657_v22 = vpop.f32.mrb[12].mxu1  ;;  %v856_v19 = vld [vmem:[%s2571_s6] sm:$0x7] }
 0x121   : > { %v698_v25 = vadd.f32 %v679_v52, %v657_v22  ;;  %v659_v26 = vpop.f32.mrb[13].mxu1  ;;  %1446 = vmatprep.subr.bf16.mxu0 %v2065_v14  ;;  %1908 = vmatprep.subr.bf16.mxu1 %v2066_v16 }
 0x122   : > { %v699_v29 = vadd.f32 %v683_v57, %v659_v26  ;;  %v661_v30 = vpop.f32.mrb[14].mxu1  ;;  %1470 = vmatprep.mubr.bf16.mxu0 %v723_v21  ;;  %1572 = vmatprep.mubr.bf16.mxu1 %v723_v21 }
 0x123   : > { %v702_v31 = vadd.f32 %v679_v52, %v661_v30  ;;  %v663_v32 = vpop.f32.mrb[15].mxu1  ;;  %v714_v36 = vmax.f32 %v698_v25, 0.0  ;;  %v2083_v52 = vld [vmem:[%s2570_s5 + $0x240] ss:$12 sps:$4 sm:$0xff]  }
 0x124   : > { %v703_v33 = vadd.f32 %v683_v57, %v663_v32  ;;  %1447 = vmatpush1.bf16.msra.mxu0 %v2063_v23  ;;  %1909 = vmatpush3.bf16.msra.mxu1 %v2067_v24  ;;  %v715_v40 = vmax.f32 %v699_v29, 0.0  ;;  %v2094_v57 = vld [vmem:[%s2570_s5 + $0x28c] ss:$12 sps:$4 sm:$0xff]  }
 0x125   : > { %v718_v37 = vmax.f32 %v702_v31, 0.0  ;;  %1448 = vmatprep.subr.bf16.mxu0 %v2070_v27  ;;  %1910 = vmatprep.subr.bf16.mxu1 %v2071_v28 }
 0x126   : > { %v719_v42 = vmax.f32 %v703_v33, 0.0 }
 0x127   : > { %v726_v43 = vpack.c.bf16 %v718_v37, %v714_v36 }
 0x128   : > { %v727_v44 = vpack.c.bf16 %v719_v42, %v715_v40  ;;  %1449 = vmatpush1.bf16.msra.mxu0 %v2068_v34  ;;  %1911 = vmatpush3.bf16.msra.mxu1 %v2072_v35  ;;  %v861_v42 = vrot.slane %v856_v19, %v2383_v15 }
 0x129   : > { %1450 = vmatprep.subr.bf16.mxu0 %v2075_v38  ;;  %1912 = vmatprep.subr.bf16.mxu1 %v2076_v39 }
 0x12c   : > { %1451 = vmatpush1.bf16.msra.mxu0 %v2073_v45  ;;  %1913 = vmatpush3.bf16.msra.mxu1 %v2077_v46  ;;  %v1601_v45 = vld [vmem:[%s2572_s7] sm:$0x7] }
 0x12d   : > { %1452 = vmatprep.subr.bf16.mxu0 %v2080_v47  ;;  %1914 = vmatprep.subr.bf16.mxu1 %v2081_v48  ;;  %v1606_v47 = vrot.slane %v1601_v45, %v2383_v15 }
 0x130   : > { %1453 = vmatpush1.bf16.msra.mxu0 %v2078_v49  ;;  %1915 = vmatpush3.bf16.msra.mxu1 %v2082_v50  ;;  %v1610_v50 = vrot.slane %v1601_v45, %v2389_v17 }
 0x131   : > { %1454 = vmatprep.subr.bf16.mxu0 %v2085_v51 }
 0x133   : > { %1573 = vmatmul.mubr.bf16.vlgmr.msra.gmra.mrb[24].mxu1 %v2446_v20 }
 0x134   : > { %1455 = vmatpush1.bf16.msra.mxu0 %v2083_v52  ;;  %1580 = vmatprep.mubr.bf16.mxu1 %v727_v44 }
 0x135   : > { %1456 = vmatprep.subr.bf16.mxu0 %v2088_v53 }
 0x138   : > { %1457 = vmatpush1.bf16.msra.mxu0 %v2086_v54 }
 0x139   : > { %1458 = vmatprep.subr.bf16.mxu0 %v2091_v55 }
 0x13b   : > { %1581 = vmatmul.mubr.bf16.gmra.mrb[28].mxu1 %v726_v43 }
 0x13c   : > { %1459 = vmatpush1.bf16.msra.mxu0 %v2089_v56 }
 0x13d   : > { %1460 = vmatprep.subr.bf16.mxu0 %v2094_v57 }
 0x140   : > { %1461 = vmatpush1.bf16.msra.mxu0 %v2092_v58  ;;  %v1614_v58 = vrot.slane %v1601_v45, %v2406_v41 }
 0x141   : > { %1462 = vmatprep.subr.bf16.mxu0 %v2097_v59 }
 0x144   : > { %1463 = vmatpush1.bf16.msra.mxu0 %v2095_v60 }
 0x145   : > { %1464 = vmatprep.subr.bf16.mxu0 %v2100_v61 }
 0x148   : > { %1465 = vmatpush1.bf16.msra.mxu0 %v2098_v62 }
 0x149   : > { %1466 = vmatprep.subr.bf16.mxu0 %v2103_v63 }
 0x14c   : > { %1467 = vmatpush1.bf16.msra.mxu0 %v2101_v1 }
 0x14d   : > { %1468 = vmatprep.subr.bf16.mxu0 %v2106_v2 }
 0x150   : > { %1469 = vmatpush1.bf16.msra.mxu0 %v2104_v3 }
 0x153   : > { %1471 = vmatmul.mubr.bf16.vlgmr.msra.gmra.mrb[0].mxu0 %v2446_v20  ;;  %v869_v20 = vrot.slane %v856_v19, %v2406_v41 }
 0x154   : > { %1480 = vmatprep.mubr.bf16.mxu0 %v727_v44 }
 0x15b   : > { %1481 = vmatmul.mubr.bf16.gmra.mrb[4].mxu0 %v726_v43  ;;  %v865_v43 = vrot.slane %v856_v19, %v2389_v17 }
 0x1e6   : > { %v1888_v4 = vpop.f32.mrb[16].mxu1 }
 0x1e7   : > { %v1889_v6 = vpop.f32.mrb[17].mxu1 }
 0x1e8   : > { %v1890_v7 = vadd.f32 %v1889_v6, %v1888_v4  ;;  %v1891_v8 = vpop.f32.mrb[18].mxu1 }
 0x1e9   : > { %v1892_v9 = vpop.f32.mrb[19].mxu1 }
 0x1ea   : > { %v1893_v10 = vadd.f32 %v1892_v9, %v1891_v8  ;;  %v1526_v23 = vadd.f32 %v1890_v7, %v869_v20 }
 0x1ec   : > { %v1529_v27 = vadd.f32 %v1893_v10, %v869_v20 }
 0x1ee   : > { %v1894_v11 = vpop.f32.mrb[20].mxu1 }
 0x1ef   : > { %v1895_v12 = vpop.f32.mrb[21].mxu1 }
 0x1f0   : > { %v1896_v13 = vadd.f32 %v1895_v12, %v1894_v11  ;;  %v1897_v14 = vpop.f32.mrb[22].mxu1 }
 0x1f1   : > { %v1898_v16 = vpop.f32.mrb[23].mxu1 }
 0x1f2   : > { %v1899_v18 = vadd.f32 %v1898_v16, %v1897_v14  ;;  %v1534_v33 = vadd.f32 %v1896_v13, %v869_v20 }
 0x1f4   : > { %v1537_v37 = vadd.f32 %v1899_v18, %v869_v20 }
 0x206   : > { %v1916_v21 = vpop.f32.mrb[24].mxu1 }
 0x207   : > { %v1917_v22 = vpop.f32.mrb[25].mxu1 }
 0x208   : > { %v1918_v24 = vadd.f32 %v1917_v22, %v1916_v21  ;;  %v1919_v25 = vpop.f32.mrb[26].mxu1 }
 0x209   : > { %v1920_v26 = vpop.f32.mrb[27].mxu1 }
 0x20a   : > { %v1575_v28 = vadd.f32 %v1918_v24, %v1526_v23  ;;  %v1921_v29 = vadd.f32 %v1920_v26, %v1919_v25 }
 0x20c   : > { %v1578_v30 = vadd.f32 %v1921_v29, %v1529_v27  ;;  %v1591_v55 = vmax.f32 %v1575_v28, 0.0 }
 0x20e   : > { %v1922_v31 = vpop.f32.mrb[28].mxu1  ;;  %v1594_v61 = vmax.f32 %v1578_v30, 0.0  ;;  %v1620_v3 = vmul.f32 %v1614_v58, %v1591_v55 }
 0x20f   : > { %v1923_v32 = vpop.f32.mrb[29].mxu1 }
 0x210   : > { %v1924_v34 = vadd.f32 %v1923_v32, %v1922_v31  ;;  %v1925_v35 = vpop.f32.mrb[30].mxu1  ;;  %v1623_v10 = vmul.f32 %v1614_v58, %v1594_v61 }
 0x211   : > { %v1926_v36 = vpop.f32.mrb[31].mxu1 }
 0x212   : > { %v1583_v38 = vadd.f32 %v1924_v34, %v1534_v33  ;;  %v1927_v39 = vadd.f32 %v1926_v36, %v1925_v35  ;;  %v1657_v34 = vand.u32 127, %v381_v0 }
 0x214   : > { %v1586_v40 = vadd.f32 %v1927_v39, %v1537_v37  ;;  %v1597_v14 = vmax.f32 %v1583_v38, 0.0  ;;  %v1662_v35 = vadd.s32 4294967288, %v1657_v34  ;;  %v1669_v37 = vadd.s32 4294967280, %v1657_v34 }
 0x215   : > { %v1647_v38 = vstv %s1646_s27  ;;  %v1660_v45 = vsub.s32 %v1657_v34, %v2186_v5 }
 0x216   : > { %v1600_v22 = vmax.f32 %v1586_v40, 0.0  ;;  %v1626_v27 = vmul.f32 %v1614_v58, %v1597_v14  ;;  %v1665_v39 = vsub.s32 %v1662_v35, %v2186_v5 }
 0x218   : > { %v1629_v30 = vmul.f32 %v1614_v58, %v1600_v22 }
 0x226   : > { %v1472_v44 = vpop.f32.mrb[0].mxu0 }
 0x227   : > { %v1928_v46 = vadd.f32 %v1472_v44, %v861_v42  ;;  %v1474_v48 = vpop.f32.mrb[1].mxu0 }
 0x228   : > { %v1929_v49 = vadd.f32 %v1474_v48, %v865_v43  ;;  %v1476_v51 = vpop.f32.mrb[2].mxu0 }
 0x229   : > { %v1589_v52 = vmax.f32 %v1928_v46, 0.0  ;;  %v1930_v53 = vadd.f32 %v1476_v51, %v861_v42  ;;  %v1478_v54 = vpop.f32.mrb[3].mxu0 }
 0x22a   : > { %v1590_v56 = vmax.f32 %v1929_v49, 0.0  ;;  %v1931_v57 = vadd.f32 %v1478_v54, %v865_v43 }
 0x22b   : > { %v1618_v59 = vmul.f32 %v1606_v47, %v1589_v52  ;;  %v1592_v60 = vmax.f32 %v1930_v53, 0.0 }
 0x22c   : > { %v1619_v62 = vmul.f32 %v1610_v50, %v1590_v56  ;;  %v1593_v63 = vmax.f32 %v1931_v57, 0.0 }
 0x22d   : > { %v1621_v1 = vmul.f32 %v1606_v47, %v1592_v60 }
 0x22e   : > { %v1622_v15 = vmul.f32 %v1610_v50, %v1593_v63  ;;  %v1482_v2 = vpop.f32.mrb[4].mxu0  ;;  %v1630_v4 = vadd.f32 %v1619_v62, %v1618_v59 }
 0x22f   : > { %v1932_v17 = vadd.f32 %v1482_v2, %v861_v42  ;;  %v1484_v6 = vpop.f32.mrb[5].mxu0 }
 0x230   : > { %v1933_v7 = vadd.f32 %v1484_v6, %v865_v43  ;;  %v1486_v8 = vpop.f32.mrb[6].mxu0  ;;  %v1631_v9 = vadd.f32 %v1630_v4, %v1620_v3  ;;  %v1634_v11 = vadd.f32 %v1622_v15, %v1621_v1 }
 0x231   : > { %v1595_v12 = vmax.f32 %v1932_v17, 0.0  ;;  %v1934_v13 = vadd.f32 %v1486_v8, %v861_v42  ;;  %v1488_v41 = vpop.f32.mrb[7].mxu0  ;;  %v1676_v42 = vadd.s32 4294967272, %v1657_v34 }
 0x232   : > { %v1596_v16 = vmax.f32 %v1933_v7, 0.0  ;;  %v1935_v18 = vadd.f32 %v1488_v41, %v865_v43  ;;  %1632 = vadd.xlane.f32.xlu0 %v1631_v9  ;;  %v1635_v19 = vadd.f32 %v1634_v11, %v1623_v10  ;;  %v1672_v43 = vsub.s32 %v1669_v37, %v2186_v5 }
 0x233   : > { %v1624_v20 = vmul.f32 %v1606_v47, %v1595_v12  ;;  %v1598_v21 = vmax.f32 %v1934_v13, 0.0  ;;  %v1679_v0 = vsub.s32 %v1676_v42, %v2186_v5 }
 0x234   : > { %v1625_v23 = vmul.f32 %v1610_v50, %v1596_v16  ;;  %v1599_v24 = vmax.f32 %v1935_v18, 0.0 }
 0x235   : > { %v1627_v25 = vmul.f32 %v1606_v47, %v1598_v21 }
 0x236   : > { %v1628_v26 = vmul.f32 %v1610_v50, %v1599_v24  ;;  %1636 = vadd.xlane.f32.xlu0 %v1635_v19  ;;  %v1638_v28 = vadd.f32 %v1625_v23, %v1624_v20 }
 0x238   : > { %v1639_v29 = vadd.f32 %v1638_v28, %v1626_v27  ;;  %v1642_v31 = vadd.f32 %v1628_v26, %v1627_v25 }
 0x23a   : > { %1640 = vadd.xlane.f32.xlu1 %v1639_v29  ;;  %v1643_v32 = vadd.f32 %v1642_v31, %v1629_v30 }
 0x23e   : > { %1644 = vadd.xlane.f32.xlu1 %v1643_v32 }
 0x2bf   : > { %v1633_v33 = vpop.xlane.xlu0 %1632 }
 0x2c0   : > { %v1648_v46 = vadd.f32 %v1647_v38, %v1633_v33 }
 0x2c2   : > { %v1661_v51 = vrot.slane %v1648_v46, %v1660_v45 }
 0x2c3   : > { %v1637_v36 = vpop.xlane.xlu0 %1636 }
 0x2c4   : > { %v1649_v40 = vadd.f32 %v1647_v38, %v1637_v36 }
 0x2c6   : > { %v1666_v48 = vrot.slane %v1649_v40, %v1665_v39 }
 0x2c7   : > { %v1641_v44 = vpop.xlane.xlu1 %1640 }
 0x2c8   : > { %v1650_v47 = vadd.f32 %v1647_v38, %v1641_v44  ;;  %v1668_v53 = vsel %vm1667_vm4, %v1666_v48, %v1661_v51 }
 0x2ca   : > { %v1673_v49 = vrot.slane %v1650_v47, %v1672_v43 }
 0x2cb   : > { %v1645_v50 = vpop.xlane.xlu1 %1644 }
 0x2cc   : > { %v1651_v52 = vadd.f32 %v1647_v38, %v1645_v50  ;;  %v1675_v55 = vsel %vm1674_vm5, %v1673_v49, %v1668_v53 }
 0x2ce   : > { %v1680_v54 = vrot.slane %v1651_v52, %v1679_v0 }
 0x2d0   : > { %v1682_v56 = vsel %vm1681_vm6, %v1680_v54, %v1675_v55 }
 0x2d1   : > { %1685 = vst.msk [vmem:[%s353_s10] sm:$0x1] %vm1684_vm7, %v1682_v56 }
 0x2d2 PF: > { %s20_s11 = sadd.s32 1, %s2113_s11  }
 0x2d3   : > { %p17_p5 = scmp.ge.s32.totalorder %s20_s11, 4  }
 0x2d5   :  { %19 = sbr.rel (!%p17_p5) target bundleno = 2 (0x2), region = 89 }

</bundles_post_ra>
